<compile_context>
chip_gen: v5e
topology: v5e:2x2
jax: 0.10.0
libtpu: 0.0.40
codegen_flags: <defaults>
</compile_context>

<pallas_src>
import functools

import jax
import jax.numpy as jnp
from jax.experimental import pallas as pl
from jax.experimental.pallas import tpu as pltpu

# ---- synthetic "cfg" (deterministic, in-script) -----------------------------
NUM_CLASSES = 8                 # cfg.MODEL.NUM_CLASSES
CLS_AGNOSTIC_BBOX_REG = False   # cfg.MODEL.CLS_AGNOSTIC_BBOX_REG
BBOX_OUT = 4 * 2 if CLS_AGNOSTIC_BBOX_REG else 4 * NUM_CLASSES


def _round_up(x, m):
    return (x + m - 1) // m * m


# ---------------------------------------------------------------------------
# Kernel: one fused matmul + bias for both heads on the current row-block.
# x is cast to the compute dtype *inside* the kernel (no extra HBM pass).
# ---------------------------------------------------------------------------
def _fused_heads_kernel(x_ref, w_ref, b_ref, o_ref):
    x = x_ref[...].astype(w_ref.dtype)
    acc = jnp.dot(x, w_ref[...], preferred_element_type=jnp.float32)
    o_ref[...] = (acc + b_ref[...]).astype(o_ref.dtype)   # f32 bias add, one cast


# ---------------------------------------------------------------------------
# One-time parameter preparation (PyTorch nn.Linear layout -> fused layout).
# ---------------------------------------------------------------------------
def prepare_params(cls_w, cls_b, bbox_w, bbox_b, compute_dtype=jnp.bfloat16):
    """cls_w:(C,D) cls_b:(C,) bbox_w:(B,D) bbox_b:(B,) -> (w_cat, b_cat, C, B)."""
    c, _ = cls_w.shape
    b = bbox_w.shape[0]
    o = c + b
    o_pad = _round_up(o, 128)                        # lane-dense output width
    w_cat = jnp.concatenate([cls_w.T, bbox_w.T], axis=1)          # (D, C+B)
    w_cat = jnp.pad(w_cat, ((0, 0), (0, o_pad - o))).astype(compute_dtype)
    b_cat = jnp.concatenate([cls_b, bbox_b]).reshape(1, o)
    b_cat = jnp.pad(b_cat, ((0, 0), (0, o_pad - o))).astype(jnp.float32)
    return w_cat, b_cat, c, b


# ---------------------------------------------------------------------------
# Forward pass.
# ---------------------------------------------------------------------------
@functools.partial(jax.jit, static_argnames=("num_cls", "num_bbox", "block_n"))
def fast_rcnn_outputs(x, w_cat, b_cat, num_cls, num_bbox, block_n=512):
    """x: (N, D) or (N, D, 1, 1). Returns (cls_score (N,C), bbox_pred (N,B))."""
    if x.ndim == 4:                           # squeeze(3).squeeze(2); 1x1 spatial
        x = x.reshape(x.shape[0], x.shape[1])
    n, d = x.shape
    o_pad = w_cat.shape[1]
    out_dtype = x.dtype

    # Row-block size: big enough for DMA efficiency, >= 8 sublanes, and capped
    # at ceil(n/2) so the parallel row axis has >=2 steps (v7x dual-TC split).
    bn = max(8, min(block_n, _round_up(-(-n // 2), 8)))
    grid_n = -(-n // bn)                      # ragged last block handled by Pallas

    out = pl.pallas_call(
        _fused_heads_kernel,
        out_shape=jax.ShapeDtypeStruct((n, o_pad), out_dtype),
        grid=(grid_n,),
        in_specs=[
            pl.BlockSpec((bn, d), lambda i: (i, 0)),        # x: streamed by row-block
            pl.BlockSpec((d, o_pad), lambda i: (0, 0)),     # fused weights: resident
            pl.BlockSpec((1, o_pad), lambda i: (0, 0)),     # fused bias: resident
        ],
        out_specs=pl.BlockSpec((bn, o_pad), lambda i: (i, 0)),
        compiler_params=pltpu.CompilerParams(
            dimension_semantics=("parallel",),              # 2-TC split on v7x
        ),
    )(x, w_cat, b_cat)

    cls_score = out[:, :num_cls]
    bbox_pred = out[:, num_cls:num_cls + num_bbox]
    return cls_score, bbox_pred


def init_params(key, dim_in):
    """Deterministic parameter init matching the PyTorch _init_weights()."""
    k1, k2 = jax.random.split(key)
    cls_w = 0.01 * jax.random.normal(k1, (NUM_CLASSES, dim_in), jnp.float32)
    cls_b = jnp.zeros((NUM_CLASSES,), jnp.float32)
    bbox_w = 0.001 * jax.random.normal(k2, (BBOX_OUT, dim_in), jnp.float32)
    bbox_b = jnp.zeros((BBOX_OUT,), jnp.float32)
    return cls_w, cls_b, bbox_w, bbox_b


if __name__ == "__main__":
    key = jax.random.PRNGKey(0)
    k_x, k_x2, k_p = jax.random.split(key, 3)

    DIM_IN = 32
    cls_w, cls_b, bbox_w, bbox_b = init_params(k_p, DIM_IN)

    # Case 1: f32 compute path, 4-D input (N, D, 1, 1) like the RoI-head output.
    # Exactness check against the f32 reference.
    w32, b32, C, B = prepare_params(cls_w, cls_b, bbox_w, bbox_b,
                                    compute_dtype=jnp.float32)
    N = 4
    x = jax.random.normal(k_x, (N, DIM_IN, 1, 1), jnp.float32)
    cls_score, bbox_pred = fast_rcnn_outputs(x, w32, b32, C, B)
    jax.block_until_ready((cls_score, bbox_pred))

    x2d = x.reshape(N, DIM_IN)
    cls_ref = x2d @ cls_w.T + cls_b
    bbox_ref = x2d @ bbox_w.T + bbox_b
    assert cls_score.shape == (N, NUM_CLASSES)
    assert bbox_pred.shape == (N, BBOX_OUT)
    assert jnp.allclose(cls_score, cls_ref, atol=1e-5)
    assert jnp.allclose(bbox_pred, bbox_ref, atol=1e-5)

    # Case 2: default bf16 compute path, 2-D input with ragged N (not a multiple
    # of 8) — exercises the ragged-last-block path, relaxed tolerance for bf16.
    wbf, bbf, C, B = prepare_params(cls_w, cls_b, bbox_w, bbox_b)  # bf16 default
    N2 = 20
    x2 = jax.random.normal(k_x2, (N2, DIM_IN), jnp.float32)
    cls2, bbox2 = fast_rcnn_outputs(x2, wbf, bbf, C, B)
    jax.block_until_ready((cls2, bbox2))
    assert cls2.shape == (N2, NUM_CLASSES)
    assert bbox2.shape == (N2, BBOX_OUT)
    assert jnp.allclose(cls2, x2 @ cls_w.T + cls_b, atol=5e-3, rtol=5e-3)
    assert jnp.allclose(bbox2, x2 @ bbox_w.T + bbox_b, atol=5e-3, rtol=5e-3)

    print("KERNEL_OK")
</pallas_src>

<mosaic_0001>
module attributes {stable_mosaic.version = 11 : i64} {
  func.func @_fused_heads_kernel(%arg0: i32, %arg1: memref<8x32xf32, #tpu.memory_space<vmem>>, %arg2: memref<32x128xf32, #tpu.memory_space<vmem>>, %arg3: memref<1x128xf32, #tpu.memory_space<vmem>>, %arg4: memref<8x128xf32, #tpu.memory_space<vmem>>) attributes {dimension_semantics = [#tpu.dimension_semantics<parallel>], iteration_bounds = array<i64: 1>, scalar_prefetch = 0 : i64, scratch_operands = 0 : i64, tpu.core_type = #tpu.core_type<tc>, window_params = [{transform_indices = @transform_0, window_bounds = array<i64: 8, 32>}, {pipeline_mode = #tpu.pipeline_mode<synchronous>, transform_indices = @transform_1, window_bounds = array<i64: 32, 128>}, {pipeline_mode = #tpu.pipeline_mode<synchronous>, transform_indices = @transform_2, window_bounds = array<i64: 1, 128>}, {transform_indices = @transform_3, window_bounds = array<i64: 8, 128>}]} {
    %c0 = arith.constant 0 : index
    %c0_0 = arith.constant 0 : index
    %0 = vector.load %arg1[%c0, %c0_0] : memref<8x32xf32, #tpu.memory_space<vmem>>, vector<8x32xf32>
    %c0_1 = arith.constant 0 : index
    %c0_2 = arith.constant 0 : index
    %1 = vector.load %arg2[%c0_1, %c0_2] : memref<32x128xf32, #tpu.memory_space<vmem>>, vector<32x128xf32>
    %cst = arith.constant dense<0.000000e+00> : vector<8x128xf32>
    %2 = tpu.matmul %0, %1, %cst {dimension_numbers = #tpu.dot_dimension_numbers<[1], [0], [0], [1], [0, 0, 1, 1], [], []>} : vector<8x32xf32>, vector<32x128xf32>, vector<8x128xf32> -> vector<8x128xf32>
    %c0_3 = arith.constant 0 : index
    %c0_4 = arith.constant 0 : index
    %3 = vector.load %arg3[%c0_3, %c0_4] : memref<1x128xf32, #tpu.memory_space<vmem>>, vector<1x128xf32>
    %4 = vector.broadcast %3 : vector<1x128xf32> to vector<8x128xf32>
    %5 = arith.addf %2, %4 : vector<8x128xf32>
    %c0_5 = arith.constant 0 : index
    %c0_6 = arith.constant 0 : index
    %6 = vector.load %arg4[%c0_5, %c0_6] : memref<8x128xf32, #tpu.memory_space<vmem>>, vector<8x128xf32>
    tpu.vector_store %arg4[%c0_5, %c0_6], %5 {strides = array<i32>} : memref<8x128xf32, #tpu.memory_space<vmem>>, vector<8x128xf32>,
    return
  }
  func.func @transform_0(%arg0: i32) -> (i32, i32) {
    %c0_i32 = arith.constant 0 : i32
    %c0_i32_0 = arith.constant 0 : i32
    return %arg0, %c0_i32 : i32, i32
  }
  func.func @transform_1(%arg0: i32) -> (i32, i32) {
    %c0_i32 = arith.constant 0 : i32
    %c0_i32_0 = arith.constant 0 : i32
    %c0_i32_1 = arith.constant 0 : i32
    return %c0_i32, %c0_i32_0 : i32, i32
  }
  func.func @transform_2(%arg0: i32) -> (i32, i32) {
    %c0_i32 = arith.constant 0 : i32
    %c0_i32_0 = arith.constant 0 : i32
    %c0_i32_1 = arith.constant 0 : i32
    return %c0_i32, %c0_i32_0 : i32, i32
  }
  func.func @transform_3(%arg0: i32) -> (i32, i32) {
    %c0_i32 = arith.constant 0 : i32
    %c0_i32_0 = arith.constant 0 : i32
    return %arg0, %c0_i32 : i32, i32
  }
}

</mosaic_0001>

<bundles_post_ra>
// kernel: fast_rcnn_outputs.1
= control target key start
LH: loop header
LB: loop body
LE: loop exit
PB: predicated region body
PF: predicated region fallthrough
CT: control target
= control target key end

     0   :  { %8 = vsyncpa [#allocation3], 0  ;;  %s221_s0 = inlined_call_operand.hbm [shape: f32[4,32], index: 0, kind: input, shape index: {}]   ;;  %s222_s1 = inlined_call_operand.hbm [shape: f32[32,128], index: 1, kind: input, shape index: {}]   ;;  %s223_s2 = inlined_call_operand.vmem [shape: f32[1,128], index: 2, kind: input, shape index: {}]   ;;  %s224_s3 = inlined_call_operand.vmem [shape: f32[4,128], index: 3, kind: output, shape index: {}]  }
   0x1   :  { %9 = vsyncpa [#allocation5], 0 }
   0x2   :  { %13 = vsyncadd [#allocation3], 64  ;;  %s14_s14 = sshll.u32 %s221_s0, 4  ;;  %s183_s15 = smov [#allocation2]   ;;  %s15_s14 = int_to_ptr.hbm [resolvable:$true] %s14_s14 }
   0x3   :  { %s16_s16 = sshll.u32 %s183_s15, 4  ;;  %s27_s19 = sshll.u32 %s222_s1, 4  ;;  %s17_s16 = int_to_ptr.vmem [resolvable:$true] %s16_s16  ;;  %s28_s19 = int_to_ptr.hbm [resolvable:$true] %s27_s19 }
   0x4   :  { %s184_s20 = smov 64   ;;  %s185_s21 = smov 4  }
   0x5   :  { %22 = dma.hbm_to_vmem [thread:$0]  %s15_s14, 64, %s17_s16, [#allocation3], %s184_s20, %s184_s20, %s185_s21  }
   0x6   :  { %s186_s22 = smov [#allocation4]   ;;  %s187_s24 = smov 128  }
   0x7   :  { %s29_s23 = sshll.u32 %s186_s22, 4  ;;  %s188_s25 = smov 8   ;;  %s30_s23 = int_to_ptr.vmem [resolvable:$true] %s29_s23 }
   0x8   :  { %35 = dma.hbm_to_vmem [thread:$0]  %s28_s19, 512, %s30_s23, [#allocation5], %s187_s24, %s187_s24, %s188_s25  }
   0x9   :  { %179 = dma.done.wait [#allocation3], 128  }
   0xa   :  { %180 = vsyncadd [#allocation3], 4294967168 }
   0xb   :  { %181 = dma.done.wait [#allocation5], 512  }
   0xc   :  { %182 = vsyncadd [#allocation5], 4294966784  ;;  %v50_v0 = vld [vmem:[#allocation4 + $0x18] sm:$0xff]  ;;  %v49_v1 = vld [vmem:[#allocation4 + $0x10] sm:$0xff]  ;;  %vm55_vm0 = vcmask 261120  }
   0xd   :  { %71 = vmatpush.msra.mxu0 %v50_v0  ;;  %v48_v2 = vld [vmem:[#allocation4 + $0x8] sm:$0xff]  ;;  %v47_v3 = vld [vmem:[#allocation4] sm:$0xff]  ;;  %v46_v4 = vld [vmem:[#allocation2] sm:$0xff] }
   0xe   :  { %v130_v5 = vld [vmem:[%s223_s2] ss:$0 sm:$0xff] }
   0xf   :  { %72 = vmatpush.msra.mxu0 %v49_v1 }
  0x11   :  { %73 = vmatpush.msra.mxu0 %v48_v2 }
  0x13   :  { %74 = vmatpush.msra.mxu0 %v47_v3 }
  0x14   :  { %123 = vmatmul.msk.f32.vlgmr.msra.gmra.mxu0 %vm55_vm0, %v46_v4 }
  0x91   :  { %v76_v6 = vpop.f32.mrf.mxu0 }
  0x92   :  { %v77_v7 = vadd.f32 %v130_v5, %v76_v6 }
  0x94   :  { %79 = vst [vmem:[#allocation6] sm:$0xff] %v77_v7 }
  0x9b   :  { %v98_v8 = vld [vmem:[#allocation6] sm:$0xf] }
  0x9c   :  { %99 = vst [vmem:[%s224_s3] sm:$0xf] %v98_v8 }
  0x9d   :  { %117 = vsyncpa [#allocation3], 1 }
  0x9e   :  { %118 = vsyncpa [#allocation5], 1 }

</bundles_post_ra>
